<compile_context>
chip_gen: v7x
topology: tpu7x:2x2x1
jax: 0.10.0
libtpu: 0.0.40
codegen_flags: <defaults>
</compile_context>

<pallas_src>
import functools

import jax
import jax.numpy as jnp
from jax.experimental import pallas as pl
from jax.experimental.pallas import tpu as pltpu

NEG_SLOPE = 0.2
BN_EPS = 1e-5


def _round_up(x, m):
    return ((x + m - 1) // m) * m


def _conv_stats_kernel(x_ref, w_ref, y_ref, psum_ref, psq_ref):
    """One lane-dense matmul tile: y = W @ X, plus per-tile BN partial stats.

    x_ref : (K, tm)     bf16  im2col activations (K = k^3 * C_in, full extent)
    w_ref : (C_out, K)  bf16  VMEM-resident (constant index_map -> fetched once)
    y_ref : (C_out, tm) f32   lane-dense output tile
    psum_ref / psq_ref : (1, C_out, 1) f32  per-tile channel sum / sum-of-squares
    """
    y = jnp.dot(w_ref[...], x_ref[...], preferred_element_type=jnp.float32)
    y_ref[...] = y
    # Fused BatchNorm statistics pass (per output channel, lane-axis reduction).
    psum_ref[0] = jnp.sum(y, axis=1, keepdims=True)
    psq_ref[0] = jnp.sum(y * y, axis=1, keepdims=True)


def _bn_norm_kernel(y_ref, scale_ref, shift_ref, o_ref):
    """Lane-dense per-channel affine normalize: o = y * scale + shift."""
    o_ref[...] = y_ref[...] * scale_ref[...] + shift_ref[...]


@functools.partial(jax.jit, static_argnames=("kernel_size", "dilation", "tm"))
def dilated_conv3_forward(x, weight, gamma, beta, *, kernel_size, dilation, tm=512):
    """x: (N, C_in, D, H, W) f32.  weight: (C_out, C_in, k, k, k).  -> (N, C_out, D, H, W) f32."""
    N, C_in, D, H, W = x.shape
    C_out = weight.shape[0]
    k = kernel_size
    dil = dilation
    pad = (k // 2) * dil
    T = k ** 3
    K = T * C_in
    M = N * D * H * W

    # Tile the flattened-spatial axis; pad M instead of falling back to a single giant tile.
    tm = max(128, min(_round_up(tm, 128), _round_up(M, 128)))
    M_pad = _round_up(M, tm)
    num_tiles = M_pad // tm

    # ---- XLA glue: LeakyReLU once (f32), im2col in (K, M) layout, bf16 cast ----
    # TODO(synk): the im2col still duplicates each input element k^3 times in HBM; the
    # fully duplication-free variant needs manual per-tap shifted-window DMA from the
    # padded NDHWC array (option (b) in the review) and is left out for robustness.
    a = jnp.where(x >= 0, x, NEG_SLOPE * x)                    # LeakyReLU(0.2), applied once
    a = jnp.transpose(a, (1, 0, 2, 3, 4))                      # (C_in, N, D, H, W)
    a = jnp.pad(a, ((0, 0), (0, 0), (pad, pad), (pad, pad), (pad, pad)))
    taps = []
    for kd in range(k):
        for kh in range(k):
            for kw in range(k):
                taps.append(
                    a[:, :, kd * dil:kd * dil + D,
                          kh * dil:kh * dil + H,
                          kw * dil:kw * dil + W].reshape(C_in, M))
    cols = jnp.stack(taps, axis=0).reshape(K, M).astype(jnp.bfloat16)
    cols = jnp.pad(cols, ((0, 0), (0, M_pad - M)))             # zero columns: stats-neutral

    # (C_out, C_in, kd, kh, kw) -> (C_out, K), K index = tap*C_in + c_in (matches cols)
    w2 = jnp.transpose(weight, (0, 2, 3, 4, 1)).reshape(C_out, K).astype(jnp.bfloat16)

    # ---- Pallas kernel 1: fused dilated-conv matmul + per-tile BN partial stats ----
    y, psum, psq = pl.pallas_call(
        _conv_stats_kernel,
        out_shape=(
            jax.ShapeDtypeStruct((C_out, M_pad), jnp.float32),
            jax.ShapeDtypeStruct((num_tiles, C_out, 1), jnp.float32),
            jax.ShapeDtypeStruct((num_tiles, C_out, 1), jnp.float32),
        ),
        grid=(num_tiles,),
        in_specs=[
            pl.BlockSpec((K, tm), lambda i: (0, i)),
            pl.BlockSpec((C_out, K), lambda i: (0, 0)),        # VMEM-resident weights
        ],
        out_specs=(
            pl.BlockSpec((C_out, tm), lambda i: (0, i)),
            pl.BlockSpec((1, C_out, 1), lambda i: (i, 0, 0)),
            pl.BlockSpec((1, C_out, 1), lambda i: (i, 0, 0)),
        ),
        compiler_params=pltpu.CompilerParams(dimension_semantics=("parallel",)),
    )(cols, w2)

    # ---- tiny per-channel finalize (C_out scalars) in plain JAX ----
    s = jnp.sum(psum[:, :, 0], axis=0)                         # (C_out,)
    ss = jnp.sum(psq[:, :, 0], axis=0)
    mean = s / M                                               # divide by true M
    var = jnp.maximum(ss / M - mean * mean, 0.0)               # biased var (BN training)
    inv = jax.lax.rsqrt(var + BN_EPS)
    scale = (gamma * inv).reshape(C_out, 1).astype(jnp.float32)
    shift = (beta - mean * gamma * inv).reshape(C_out, 1).astype(jnp.float32)

    # ---- Pallas kernel 2: tiled, lane-dense BatchNorm normalize ----
    out = pl.pallas_call(
        _bn_norm_kernel,
        out_shape=jax.ShapeDtypeStruct((C_out, M_pad), jnp.float32),
        grid=(num_tiles,),
        in_specs=[
            pl.BlockSpec((C_out, tm), lambda i: (0, i)),
            pl.BlockSpec((C_out, 1), lambda i: (0, 0)),
            pl.BlockSpec((C_out, 1), lambda i: (0, 0)),
        ],
        out_specs=pl.BlockSpec((C_out, tm), lambda i: (0, i)),
        compiler_params=pltpu.CompilerParams(dimension_semantics=("parallel",)),
    )(y, scale, shift)

    out = out[:, :M].reshape(C_out, N, D, H, W)
    return jnp.transpose(out, (1, 0, 2, 3, 4))                 # back to NCDHW


def ref_forward(x, weight, gamma, beta, *, dilation, pad):
    """Pure-JAX f32 reference of the PyTorch forward (NCDHW)."""
    y = jnp.where(x >= 0, x, NEG_SLOPE * x)
    y = jax.lax.conv_general_dilated(
        y, weight, window_strides=(1, 1, 1),
        padding=[(pad, pad)] * 3,
        rhs_dilation=(dilation,) * 3,
        dimension_numbers=("NCDHW", "OIDHW", "NCDHW"))
    mean = jnp.mean(y, axis=(0, 2, 3, 4), keepdims=True)
    var = jnp.mean((y - mean) ** 2, axis=(0, 2, 3, 4), keepdims=True)
    g = gamma.reshape(1, -1, 1, 1, 1)
    b = beta.reshape(1, -1, 1, 1, 1)
    return (y - mean) * jax.lax.rsqrt(var + BN_EPS) * g + b


if __name__ == "__main__":
    key = jax.random.PRNGKey(0)
    kx, kw = jax.random.split(key)

    N, C_in, C_out = 2, 4, 8
    D = H = W = 8
    kernel_size, dilation = 3, 2          # padding = (3 // 2) * 2 = 2 -> "same" output

    x = jax.random.normal(kx, (N, C_in, D, H, W), jnp.float32)
    weight = 0.1 * jax.random.normal(
        kw, (C_out, C_in, kernel_size, kernel_size, kernel_size), jnp.float32)
    gamma = jnp.ones((C_out,), jnp.float32)    # BatchNorm3d affine init
    beta = jnp.zeros((C_out,), jnp.float32)

    out = dilated_conv3_forward(
        x, weight, gamma, beta, kernel_size=kernel_size, dilation=dilation)
    out = jax.block_until_ready(out)

    ref = ref_forward(x, weight, gamma, beta,
                      dilation=dilation, pad=(kernel_size // 2) * dilation)
    assert out.shape == (N, C_out, D, H, W), out.shape
    err = float(jnp.max(jnp.abs(out - ref)))
    # bf16 MXU inputs vs f32 reference: expected max abs error ~1e-2 after BN scaling.
    assert err < 3e-2, f"max abs err {err}"
    print("KERNEL_OK")
</pallas_src>

<mosaic_0001>
module attributes {stable_mosaic.version = 11 : i64} {
  func.func @_conv_stats_kernel(%arg0: i32, %arg1: memref<108x512xbf16, #tpu.memory_space<vmem>>, %arg2: memref<8x108xbf16, #tpu.memory_space<vmem>>, %arg3: memref<8x512xf32, #tpu.memory_space<vmem>>, %arg4: memref<1x8x1xf32, #tpu.memory_space<vmem>>, %arg5: memref<1x8x1xf32, #tpu.memory_space<vmem>>) attributes {dimension_semantics = [#tpu.dimension_semantics<parallel>], iteration_bounds = array<i64: 2>, scalar_prefetch = 0 : i64, scratch_operands = 0 : i64, tpu.core_type = #tpu.core_type<tc>, window_params = [{transform_indices = @transform_0, window_bounds = array<i64: 108, 512>}, {pipeline_mode = #tpu.pipeline_mode<synchronous>, transform_indices = @transform_1, window_bounds = array<i64: 8, 108>}, {transform_indices = @transform_2, window_bounds = array<i64: 8, 512>}, {transform_indices = @transform_3, window_bounds = array<i64: 1, 8, 1>}, {transform_indices = @transform_4, window_bounds = array<i64: 1, 8, 1>}]} {
    %c0 = arith.constant 0 : index
    %c0_0 = arith.constant 0 : index
    %0 = vector.load %arg2[%c0, %c0_0] : memref<8x108xbf16, #tpu.memory_space<vmem>>, vector<8x108xbf16>
    %c0_1 = arith.constant 0 : index
    %c0_2 = arith.constant 0 : index
    %1 = vector.load %arg1[%c0_1, %c0_2] : memref<108x512xbf16, #tpu.memory_space<vmem>>, vector<108x512xbf16>
    %cst = arith.constant dense<0.000000e+00> : vector<8x512xf32>
    %2 = tpu.matmul %0, %1, %cst {dimension_numbers = #tpu.dot_dimension_numbers<[1], [0], [0], [1], [0, 0, 1, 1], [], []>} : vector<8x108xbf16>, vector<108x512xbf16>, vector<8x512xf32> -> vector<8x512xf32>
    %c0_3 = arith.constant 0 : index
    %c0_4 = arith.constant 0 : index
    %3 = vector.load %arg3[%c0_3, %c0_4] : memref<8x512xf32, #tpu.memory_space<vmem>>, vector<8x512xf32>
    tpu.vector_store %arg3[%c0_3, %c0_4], %2 {strides = array<i32>} : memref<8x512xf32, #tpu.memory_space<vmem>>, vector<8x512xf32>,
    %cst_5 = arith.constant dense<0.000000e+00> : vector<8xf32>
    %4 = vector.multi_reduction <add>, %2, %cst_5 [1] : vector<8x512xf32> to vector<8xf32>
    %5 = vector.shape_cast %4 : vector<8xf32> to vector<8x1xf32>
    %c0_6 = arith.constant 0 : index
    %c0_7 = arith.constant 0 : index
    %c0_8 = arith.constant 0 : index
    %6 = vector.load %arg4[%c0_6, %c0_7, %c0_8] : memref<1x8x1xf32, #tpu.memory_space<vmem>>, vector<1x8x1xf32>
    %7 = vector.shape_cast %6 : vector<1x8x1xf32> to vector<8x1xf32>
    %8 = vector.shape_cast %5 : vector<8x1xf32> to vector<1x8x1xf32>
    tpu.vector_store %arg4[%c0_6, %c0_7, %c0_8], %8 {strides = array<i32>} : memref<1x8x1xf32, #tpu.memory_space<vmem>>, vector<1x8x1xf32>,
    %9 = arith.mulf %2, %2 : vector<8x512xf32>
    %cst_9 = arith.constant dense<0.000000e+00> : vector<8xf32>
    %10 = vector.multi_reduction <add>, %9, %cst_9 [1] : vector<8x512xf32> to vector<8xf32>
    %11 = vector.shape_cast %10 : vector<8xf32> to vector<8x1xf32>
    %c0_10 = arith.constant 0 : index
    %c0_11 = arith.constant 0 : index
    %c0_12 = arith.constant 0 : index
    %12 = vector.load %arg5[%c0_10, %c0_11, %c0_12] : memref<1x8x1xf32, #tpu.memory_space<vmem>>, vector<1x8x1xf32>
    %13 = vector.shape_cast %12 : vector<1x8x1xf32> to vector<8x1xf32>
    %14 = vector.shape_cast %11 : vector<8x1xf32> to vector<1x8x1xf32>
    tpu.vector_store %arg5[%c0_10, %c0_11, %c0_12], %14 {strides = array<i32>} : memref<1x8x1xf32, #tpu.memory_space<vmem>>, vector<1x8x1xf32>,
    return
  }
  func.func @transform_0(%arg0: i32) -> (i32, i32) {
    %c0_i32 = arith.constant 0 : i32
    %c0_i32_0 = arith.constant 0 : i32
    return %c0_i32, %arg0 : i32, i32
  }
  func.func @transform_1(%arg0: i32) -> (i32, i32) {
    %c0_i32 = arith.constant 0 : i32
    %c0_i32_0 = arith.constant 0 : i32
    %c0_i32_1 = arith.constant 0 : i32
    return %c0_i32, %c0_i32_0 : i32, i32
  }
  func.func @transform_2(%arg0: i32) -> (i32, i32) {
    %c0_i32 = arith.constant 0 : i32
    %c0_i32_0 = arith.constant 0 : i32
    return %c0_i32, %arg0 : i32, i32
  }
  func.func @transform_3(%arg0: i32) -> (i32, i32, i32) {
    %c0_i32 = arith.constant 0 : i32
    %c0_i32_0 = arith.constant 0 : i32
    %c0_i32_1 = arith.constant 0 : i32
    return %arg0, %c0_i32, %c0_i32_0 : i32, i32, i32
  }
  func.func @transform_4(%arg0: i32) -> (i32, i32, i32) {
    %c0_i32 = arith.constant 0 : i32
    %c0_i32_0 = arith.constant 0 : i32
    %c0_i32_1 = arith.constant 0 : i32
    return %arg0, %c0_i32, %c0_i32_0 : i32, i32, i32
  }
}

module attributes {stable_mosaic.version = 11 : i64} {
  func.func @_bn_norm_kernel(%arg0: i32, %arg1: memref<8x512xf32, #tpu.memory_space<vmem>>, %arg2: memref<8x1xf32, #tpu.memory_space<vmem>>, %arg3: memref<8x1xf32, #tpu.memory_space<vmem>>, %arg4: memref<8x512xf32, #tpu.memory_space<vmem>>) attributes {dimension_semantics = [#tpu.dimension_semantics<parallel>], iteration_bounds = array<i64: 2>, scalar_prefetch = 0 : i64, scratch_operands = 0 : i64, tpu.core_type = #tpu.core_type<tc>, window_params = [{transform_indices = @transform_0, window_bounds = array<i64: 8, 512>}, {pipeline_mode = #tpu.pipeline_mode<synchronous>, transform_indices = @transform_1, window_bounds = array<i64: 8, 1>}, {pipeline_mode = #tpu.pipeline_mode<synchronous>, transform_indices = @transform_2, window_bounds = array<i64: 8, 1>}, {transform_indices = @transform_3, window_bounds = array<i64: 8, 512>}]} {
    %c0 = arith.constant 0 : index
    %c0_0 = arith.constant 0 : index
    %0 = vector.load %arg1[%c0, %c0_0] : memref<8x512xf32, #tpu.memory_space<vmem>>, vector<8x512xf32>
    %c0_1 = arith.constant 0 : index
    %c0_2 = arith.constant 0 : index
    %1 = vector.load %arg2[%c0_1, %c0_2] : memref<8x1xf32, #tpu.memory_space<vmem>>, vector<8x1xf32>
    %2 = vector.broadcast %1 : vector<8x1xf32> to vector<8x512xf32>
    %3 = arith.mulf %0, %2 : vector<8x512xf32>
    %c0_3 = arith.constant 0 : index
    %c0_4 = arith.constant 0 : index
    %4 = vector.load %arg3[%c0_3, %c0_4] : memref<8x1xf32, #tpu.memory_space<vmem>>, vector<8x1xf32>
    %5 = vector.broadcast %4 : vector<8x1xf32> to vector<8x512xf32>
    %6 = arith.addf %3, %5 : vector<8x512xf32>
    %c0_5 = arith.constant 0 : index
    %c0_6 = arith.constant 0 : index
    %7 = vector.load %arg4[%c0_5, %c0_6] : memref<8x512xf32, #tpu.memory_space<vmem>>, vector<8x512xf32>
    tpu.vector_store %arg4[%c0_5, %c0_6], %6 {strides = array<i32>} : memref<8x512xf32, #tpu.memory_space<vmem>>, vector<8x512xf32>,
    return
  }
  func.func @transform_0(%arg0: i32) -> (i32, i32) {
    %c0_i32 = arith.constant 0 : i32
    %c0_i32_0 = arith.constant 0 : i32
    return %c0_i32, %arg0 : i32, i32
  }
  func.func @transform_1(%arg0: i32) -> (i32, i32) {
    %c0_i32 = arith.constant 0 : i32
    %c0_i32_0 = arith.constant 0 : i32
    %c0_i32_1 = arith.constant 0 : i32
    return %c0_i32, %c0_i32_0 : i32, i32
  }
  func.func @transform_2(%arg0: i32) -> (i32, i32) {
    %c0_i32 = arith.constant 0 : i32
    %c0_i32_0 = arith.constant 0 : i32
    %c0_i32_1 = arith.constant 0 : i32
    return %c0_i32, %c0_i32_0 : i32, i32
  }
  func.func @transform_3(%arg0: i32) -> (i32, i32) {
    %c0_i32 = arith.constant 0 : i32
    %c0_i32_0 = arith.constant 0 : i32
    return %c0_i32, %arg0 : i32, i32
  }
}

</mosaic_0001>

<bundles_post_ra>
// kernel: dilated_conv3_forward.3
= control target key start
LH: loop header
LB: loop body
LE: loop exit
PB: predicated region body
PF: predicated region fallthrough
CT: control target
= control target key end

     0   :  { %s308_s12 = smov 0   ;;  %s331_s0 = inlined_call_operand.vmem [shape: f32[8,1024], index: 0, kind: input, shape index: {}]   ;;  %s332_s1 = inlined_call_operand.vmem [shape: f32[8,1], index: 1, kind: input, shape index: {}]   ;;  %s333_s2 = inlined_call_operand.vmem [shape: f32[8,1], index: 2, kind: input, shape index: {}]   ;;  %s334_s3 = inlined_call_operand.vmem [shape: f32[8,1024], index: 3, kind: output, shape index: {}]  }
   0x1 LB: > { %s258_s13 = sadd.s32 4294967295, %s285_s12   ;;  %p262_p0 = scmp.ge.s32.totalorder %s285_s12, 1  ;;  %s285_s12 = sphi %s308_s12, %s13_s12  }
   0x2   : > { %p138_p1 = scmp.lt.s32.totalorder %s285_s12, 3 }
   0x4   : > { %p139_p2 = pnand %p262_p0, %p138_p1 }
   0x5   : > { %v178_v0 = vld [vmem:[%s332_s1] sm:$0xff] (!%p139_p2)  ;;  %v287_v1 = vmov (!%p139_p2), 0   ;;  %s263_s18 = sshll.u32 (!%p139_p2), %s258_s13, 2 }
   0x6   : > { %142 = sbr.rel (%p139_p2) target bundleno = 143 (0x8f), region = 32  ;;  %278 = vset.pattern.permute.xlu0 (!%p139_p2), %v287_v1  ;;  %v188_v2 = vld [vmem:[%s333_s2] sm:$0xff] (!%p139_p2)  ;;  %p163_p3 = scmp.lt.s32.totalorder (!%p139_p2), %s263_s18, 7 }
   0x7   : > { %181 = vperm.xlu0 (!%p139_p2), %278, %v178_v0  }
   0xb   : > { %191 = vperm.xlu0 (!%p139_p2), %278, %v188_v2  }
   0xd   : > { %s336_s18 = smov (!%p163_p3, %s263_s18), 7 }
   0xe   : > { %s264_s19 = sshll.u32 %s336_s18, 3 }
   0xf   : > { %s166_s22 = scalar_lea.vmem %s331_s0, %s264_s19  ;;  %s172_s25 = scalar_lea.vmem %s334_s3, %s264_s19 }
  0x10   : > { %v174_v4 = vld [vmem:[%s166_s22] sm:$0xff]  ;;  %v175_v5 = vld [vmem:[%s166_s22 + $0x8] sm:$0xff]  ;;  %v176_v6 = vld [vmem:[%s166_s22 + $0x10] sm:$0xff] }
  0x11   : > { %v177_v7 = vld [vmem:[%s166_s22 + $0x18] sm:$0xff] }
  0x86   : > { %v182_v3 = vpop.permute.xlu0 %181 }
  0x87   : > { %v184_v8 = vmul.f32 %v182_v3, %v174_v4  ;;  %v185_v9 = vmul.f32 %v182_v3, %v175_v5  ;;  %v186_v11 = vmul.f32 %v182_v3, %v176_v6  ;;  %v187_v14 = vmul.f32 %v182_v3, %v177_v7 }
  0x8a   : > { %v192_v10 = vpop.permute.xlu0 %191 }
  0x8b   : > { %v194_v12 = vadd.f32 %v192_v10, %v184_v8  ;;  %v195_v13 = vadd.f32 %v192_v10, %v185_v9  ;;  %v196_v15 = vadd.f32 %v192_v10, %v186_v11  ;;  %v197_v16 = vadd.f32 %v192_v10, %v187_v14 }
  0x8d   : > { %198 = vst [vmem:[%s172_s25] sm:$0xff] %v194_v12  ;;  %199 = vst [vmem:[%s172_s25 + $0x8] sm:$0xff] %v195_v13 }
  0x8e   : > { %200 = vst [vmem:[%s172_s25 + $0x10] sm:$0xff] %v196_v15  ;;  %201 = vst [vmem:[%s172_s25 + $0x18] sm:$0xff] %v197_v16 }
  0x8f PF: > { %s13_s12 = sadd.s32 1, %s285_s12  }
  0x90   : > { %p10_p4 = scmp.ge.s32.totalorder %s13_s12, 4  }
  0x92   :  { %12 = sbr.rel (!%p10_p4) target bundleno = 1 (0x1), region = 62 }

// kernel: dilated_conv3_forward.2
= control target key start
LH: loop header
LB: loop body
LE: loop exit
PB: predicated region body
PF: predicated region fallthrough
CT: control target
= control target key end

     0   :  { %s870_s15 = smov 0   ;;  %s872_s16 = smov 0   ;;  %s1024_s0 = inlined_call_operand.vmem [shape: bf16[108,1024], index: 0, kind: input, shape index: {}]   ;;  %s1025_s1 = inlined_call_operand.vmem [shape: bf16[8,108], index: 1, kind: input, shape index: {}]   ;;  %s1026_s2 = inlined_call_operand.vmem [shape: f32[8,1024], index: 2, kind: output, shape index: {0}]   ;;  %s1027_s3 = inlined_call_operand.vmem [shape: f32[2,8,1], index: 3, kind: output, shape index: {1}]   ;;  %s1028_s4 = inlined_call_operand.vmem [shape: f32[2,8,1], index: 4, kind: output, shape index: {2}]  }
   0x1   :  { %s874_s17 = smov 0  }
   0x2 LB: > { %s886_s18 = sadd.s32 4294967295, %s842_s17   ;;  %s889_s19 = sadd.s32 1, %s842_s17   ;;  %s842_s17 = sphi %s874_s17, %s1031_s17   ;;  %s838_s16 = sphi %s872_s16, %s1030_s16   ;;  %s834_s15 = sphi %s870_s15, %s1029_s15  }
   0x3   : > { %s19_s20 = ssub.s32 %s842_s17, %s889_s19  ;;  %s22_s21 = sadd.s32 1, %s838_s16 }
   0x4   : > { %p20_p0 = scmp.eq.s32.totalorder %s19_s20, 0  ;;  %p29_p1 = scmp.ne.s32.totalorder %s838_s16, %s834_s15 }
   0x5   : > { %p30_p2 = scmp.eq.s32.totalorder %s842_s17, 0  ;;  %p708_p4 = scmp.ge.s32.totalorder %s842_s17, 2 }
   0x6   : > { %s898_s22 = scalar_select %p20_p0, %s838_s16, %s22_s21  }
   0x7   : > { %p31_p3 = por %p30_p2, %p29_p1  ;;  %157 = sbr.rel (%p708_p4) target bundleno = 32 (0x20), region = 20 }
   0xe   : > { %160 = sbr.rel (!%p31_p3) target bundleno = 32 (0x20), region = 24  ;;  %s162_s23 = sand.u32 (%p31_p3), 1, %s838_s16  }
   0xf   : > { %s750_s24 = sshll.u32 (%p31_p3), %s842_s17, 4  ;;  %s751_s25 = smul.u32 (%p31_p3), 224, %s162_s23 }
  0x10   : > { %s906_s28 = scalar_lea.vmem (%p31_p3), %s1024_s0, %s750_s24 }
  0x11   : > { %v180_v0 = vld [vmem:[%s906_s28] sm:$0xff] (%p31_p3)  ;;  %v182_v1 = vld [vmem:[%s906_s28 + $0x8] sm:$0xff] (%p31_p3)  ;;  %s914_s29 = scalar_lea.vmem (%p31_p3), [#allocation2], %s751_s25 }
  0x12   : > { %v184_v2 = vld [vmem:[%s906_s28 + $0x20] sm:$0xff] (%p31_p3)  ;;  %v186_v3 = vld [vmem:[%s906_s28 + $0x28] sm:$0xff] (%p31_p3)  ;;  %181 = vst [vmem:[%s914_s29] sm:$0xff] (%p31_p3), %v180_v0  ;;  %183 = vst [vmem:[%s914_s29 + $0x8] sm:$0xff] (%p31_p3), %v182_v1 }
  0x13   : > { %v188_v4 = vld [vmem:[%s906_s28 + $0x40] sm:$0xff] (%p31_p3)  ;;  %v190_v5 = vld [vmem:[%s906_s28 + $0x48] sm:$0xff] (%p31_p3)  ;;  %185 = vst [vmem:[%s914_s29 + $0x10] sm:$0xff] (%p31_p3), %v184_v2  ;;  %187 = vst [vmem:[%s914_s29 + $0x18] sm:$0xff] (%p31_p3), %v186_v3 }
  0x14   : > { %189 = vst [vmem:[%s914_s29 + $0x20] sm:$0xff] (%p31_p3), %v188_v4  ;;  %191 = vst [vmem:[%s914_s29 + $0x28] sm:$0xff] (%p31_p3), %v190_v5  ;;  %v192_v6 = vld [vmem:[%s906_s28 + $0x60] sm:$0xff] (%p31_p3)  ;;  %v194_v7 = vld [vmem:[%s906_s28 + $0x68] sm:$0xff] (%p31_p3) }
  0x15   : > { %v196_v8 = vld [vmem:[%s906_s28 + $0x80] sm:$0xff]  ;;  %193 = vst [vmem:[%s914_s29 + $0x30] sm:$0xff] %v192_v6  ;;  %195 = vst [vmem:[%s914_s29 + $0x38] sm:$0xff] %v194_v7  ;;  %v198_v9 = vld [vmem:[%s906_s28 + $0x88] sm:$0xff] }
  0x16   : > { %197 = vst [vmem:[%s914_s29 + $0x40] sm:$0xff] %v196_v8  ;;  %v200_v10 = vld [vmem:[%s906_s28 + $0xa0] sm:$0xff]  ;;  %v202_v11 = vld [vmem:[%s906_s28 + $0xa8] sm:$0xff]  ;;  %199 = vst [vmem:[%s914_s29 + $0x48] sm:$0xff] %v198_v9 }
  0x17   : > { %201 = vst [vmem:[%s914_s29 + $0x50] sm:$0xff] %v200_v10  ;;  %203 = vst [vmem:[%s914_s29 + $0x58] sm:$0xff] %v202_v11  ;;  %v204_v12 = vld [vmem:[%s906_s28 + $0xc0] sm:$0xff]  ;;  %v206_v13 = vld [vmem:[%s906_s28 + $0xc8] sm:$0xff] }
  0x18   : > { %v208_v14 = vld [vmem:[%s906_s28 + $0xe0] sm:$0xff]  ;;  %205 = vst [vmem:[%s914_s29 + $0x60] sm:$0xff] %v204_v12  ;;  %207 = vst [vmem:[%s914_s29 + $0x68] sm:$0xff] %v206_v13  ;;  %v210_v15 = vld [vmem:[%s906_s28 + $0xe8] sm:$0xff] }
  0x19   : > { %209 = vst [vmem:[%s914_s29 + $0x70] sm:$0xff] %v208_v14  ;;  %v212_v16 = vld [vmem:[%s906_s28 + $0x100] sm:$0xff]  ;;  %v214_v17 = vld [vmem:[%s906_s28 + $0x108] sm:$0xff]  ;;  %211 = vst [vmem:[%s914_s29 + $0x78] sm:$0xff] %v210_v15 }
  0x1a   : > { %213 = vst [vmem:[%s914_s29 + $0x80] sm:$0xff] %v212_v16  ;;  %215 = vst [vmem:[%s914_s29 + $0x88] sm:$0xff] %v214_v17  ;;  %v216_v18 = vld [vmem:[%s906_s28 + $0x120] sm:$0xff]  ;;  %v218_v19 = vld [vmem:[%s906_s28 + $0x128] sm:$0xff] }
  0x1b   : > { %v220_v20 = vld [vmem:[%s906_s28 + $0x140] sm:$0xff]  ;;  %217 = vst [vmem:[%s914_s29 + $0x90] sm:$0xff] %v216_v18  ;;  %219 = vst [vmem:[%s914_s29 + $0x98] sm:$0xff] %v218_v19  ;;  %v222_v21 = vld [vmem:[%s906_s28 + $0x148] sm:$0xff] }
  0x1c   : > { %221 = vst [vmem:[%s914_s29 + $0xa0] sm:$0xff] %v220_v20  ;;  %v224_v22 = vld [vmem:[%s906_s28 + $0x160] sm:$0xff]  ;;  %v226_v23 = vld [vmem:[%s906_s28 + $0x168] sm:$0xff]  ;;  %223 = vst [vmem:[%s914_s29 + $0xa8] sm:$0xff] %v222_v21 }
  0x1d   : > { %225 = vst [vmem:[%s914_s29 + $0xb0] sm:$0xff] %v224_v22  ;;  %227 = vst [vmem:[%s914_s29 + $0xb8] sm:$0xff] %v226_v23  ;;  %v228_v24 = vld [vmem:[%s906_s28 + $0x180] sm:$0xff]  ;;  %v230_v25 = vld [vmem:[%s906_s28 + $0x188] sm:$0xff] }
  0x1e   : > { %v232_v26 = vld [vmem:[%s906_s28 + $0x1a0] sm:$0xff]  ;;  %229 = vst [vmem:[%s914_s29 + $0xc0] sm:$0xff] %v228_v24  ;;  %231 = vst [vmem:[%s914_s29 + $0xc8] sm:$0xff] %v230_v25  ;;  %v234_v27 = vld [vmem:[%s906_s28 + $0x1a8] sm:$0xff] }
  0x1f   : > { %233 = vst [vmem:[%s914_s29 + $0xd0] sm:$0xff] %v232_v26  ;;  %235 = vst [vmem:[%s914_s29 + $0xd8] sm:$0xff] %v234_v27 }
  0x20 PF: > { %p711_p5 = scmp.ge.s32.totalorder %s842_s17, 1  ;;  %p240_p6 = scmp.lt.s32.totalorder %s842_s17, 3 }
  0x22   : > { %p241_p7 = pnand %p711_p5, %p240_p6 }
  0x23   : > { %s247_s30 = sand.u32 (!%p241_p7), 1, %s834_s15   ;;  %v844_v28 = vmov (!%p241_p7), 0   ;;  %vm465_vm0 = vcmask (!%p241_p7), 1045504   ;;  %v296_v59 = vld [vmem:[%s1025_s1] sm:$0xf] (!%p241_p7)  ;;  %vm461_vm1 = vcmask (!%p241_p7), 883712  }
  0x24   : > { %244 = sbr.rel (%p241_p7) target bundleno = 435 (0x1b3), region = 47  ;;  %510 = vmatprep.mubr.bf16.mxu0 (!%p241_p7), %v844_v28  ;;  %551 = vmatprep.mubr.bf16.mxu1 (!%p241_p7), %v844_v28  ;;  %s712_s9 = sshll.u32 (!%p241_p7), %s886_s18, 2  ;;  %vm569_vm2 = vcmask (!%p241_p7), 7168  }
  0x25   : > { %s752_s5 = smul.u32 (!%p241_p7), 224, %s247_s30  ;;  %p282_p8 = scmp.lt.s32.totalorder (!%p241_p7), %s712_s9, 7 }
  0x26   : > { %p287_p9 = scmp.lt.s32.totalorder (!%p241_p7), %s886_s18, 1 }
  0x27   : > { %s969_s6 = scalar_lea.vmem (!%p241_p7), [#allocation2], %s752_s5 }
  0x28   : > { %v778_v29 = vld [vmem:[%s969_s6 + $0x4] ss:$16 sps:$4 sm:$0xff] (!%p241_p7)   ;;  %v780_v30 = vld [vmem:[%s969_s6 + $0xc] ss:$16 sps:$4 sm:$0xff] (!%p241_p7)   ;;  %v782_v31 = vld [vmem:[%s969_s6] ss:$16 sps:$4 sm:$0xff] (!%p241_p7)  }
  0x29   : > { %478 = vmatprep.subr.bf16.mxu0 (!%p241_p7), %v778_v29  ;;  %v783_v32 = vld [vmem:[%s969_s6 + $0x8] ss:$16 sps:$4 sm:$0xff] (!%p241_p7)   ;;  %519 = vmatprep.subr.bf16.mxu1 (!%p241_p7), %v780_v30  ;;  %v784_v33 = vld [vmem:[%s969_s6 + $0x24] ss:$16 sps:$4 sm:$0xff] (!%p241_p7)   ;;  %v786_v34 = vld [vmem:[%s969_s6 + $0x2c] ss:$16 sps:$4 sm:$0xff] (!%p241_p7)  }
  0x2a   : > { %479 = vmatpush1.bf16.msra.mxu0 (!%p241_p7), %v782_v31  ;;  %520 = vmatpush1.bf16.msra.mxu1 (!%p241_p7), %v783_v32  ;;  %v788_v35 = vld [vmem:[%s969_s6 + $0x20] ss:$16 sps:$4 sm:$0xff] (!%p241_p7)   ;;  %v789_v36 = vld [vmem:[%s969_s6 + $0x28] ss:$16 sps:$4 sm:$0xff] (!%p241_p7)   ;;  %v790_v37 = vld [vmem:[%s969_s6 + $0x44] ss:$16 sps:$4 sm:$0xff] (!%p241_p7)  }
  0x2b   : > { %480 = vmatprep.subr.bf16.mxu0 %v784_v33  ;;  %521 = vmatprep.subr.bf16.mxu1 %v786_v34  ;;  %v792_v38 = vld [vmem:[%s969_s6 + $0x4c] ss:$16 sps:$4 sm:$0xff]   ;;  %v794_v39 = vld [vmem:[%s969_s6 + $0x40] ss:$16 sps:$4 sm:$0xff]   ;;  %v795_v40 = vld [vmem:[%s969_s6 + $0x48] ss:$16 sps:$4 sm:$0xff]  }
  0x2c   : > { %v796_v41 = vld [vmem:[%s969_s6 + $0x64] ss:$16 sps:$4 sm:$0xff]   ;;  %v798_v42 = vld [vmem:[%s969_s6 + $0x6c] ss:$16 sps:$4 sm:$0xff]   ;;  %v800_v43 = vld [vmem:[%s969_s6 + $0x60] ss:$16 sps:$4 sm:$0xff]  }
  0x2d   : > { %v801_v44 = vld [vmem:[%s969_s6 + $0x68] ss:$16 sps:$4 sm:$0xff]   ;;  %v802_v45 = vld [vmem:[%s969_s6 + $0x84] ss:$16 sps:$4 sm:$0xff]   ;;  %v804_v46 = vld [vmem:[%s969_s6 + $0x8c] ss:$16 sps:$4 sm:$0xff]  }
  0x2e   : > { %481 = vmatpush1.bf16.msra.mxu0 %v788_v35  ;;  %522 = vmatpush1.bf16.msra.mxu1 %v789_v36  ;;  %v806_v47 = vld [vmem:[%s969_s6 + $0x80] ss:$16 sps:$4 sm:$0xff]   ;;  %v807_v48 = vld [vmem:[%s969_s6 + $0x88] ss:$16 sps:$4 sm:$0xff]   ;;  %v808_v49 = vld [vmem:[%s969_s6 + $0xa4] ss:$16 sps:$4 sm:$0xff]  }
  0x2f   : > { %482 = vmatprep.subr.bf16.mxu0 %v790_v37  ;;  %523 = vmatprep.subr.bf16.mxu1 %v792_v38  ;;  %v810_v50 = vld [vmem:[%s969_s6 + $0xac] ss:$16 sps:$4 sm:$0xff]   ;;  %v812_v51 = vld [vmem:[%s969_s6 + $0xa0] ss:$16 sps:$4 sm:$0xff]   ;;  %v813_v52 = vld [vmem:[%s969_s6 + $0xa8] ss:$16 sps:$4 sm:$0xff]  }
  0x30   : > { %v814_v53 = vld [vmem:[%s969_s6 + $0xc4] ss:$16 sps:$4 sm:$0x3f]   ;;  %v816_v54 = vld [vmem:[%s969_s6 + $0xcc] ss:$16 sps:$4 sm:$0x3f]  }
  0x31   : > { %v818_v55 = vld [vmem:[%s969_s6 + $0xc0] ss:$16 sps:$4 sm:$0x3f]   ;;  %v819_v56 = vld [vmem:[%s969_s6 + $0xc8] ss:$16 sps:$4 sm:$0x3f]  }
  0x32   : > { %483 = vmatpush1.bf16.msra.mxu0 %v794_v39  ;;  %524 = vmatpush1.bf16.msra.mxu1 %v795_v40  ;;  %v467_v57 = vsel %vm465_vm0, %v818_v55, 0  ;;  %v473_v58 = vsel %vm465_vm0, %v819_v56, 0  ;;  %s1033_s9 = smov (!%p282_p8, %s712_s9), 7  ;;  %s1035_s18 = smov (!%p287_p9, %s886_s18), 1 }
  0x33   : > { %484 = vmatprep.subr.bf16.mxu0 %v796_v41  ;;  %525 = vmatprep.subr.bf16.mxu1 %v798_v42  ;;  %s713_s10 = sshll.u32 %s1033_s9, 3  ;;  %s714_s14 = sshll.u32 %s1035_s18, 3 }
  0x34   : > { %s285_s13 = scalar_lea.vmem %s1026_s2, %s713_s10  ;;  %s290_s20 = scalar_lea.vmem %s1027_s3, %s714_s14 }
  0x35   : > { %s294_s24 = scalar_lea.vmem %s1028_s4, %s714_s14 }
  0x36   : > { %485 = vmatpush1.bf16.msra.mxu0 %v800_v43  ;;  %526 = vmatpush1.bf16.msra.mxu1 %v801_v44 }
  0x37   : > { %486 = vmatprep.subr.bf16.mxu0 %v802_v45  ;;  %527 = vmatprep.subr.bf16.mxu1 %v804_v46 }
  0x3a   : > { %487 = vmatpush1.bf16.msra.mxu0 %v806_v47  ;;  %528 = vmatpush1.bf16.msra.mxu1 %v807_v48 }
  0x3b   : > { %488 = vmatprep.subr.bf16.mxu0 %v808_v49  ;;  %529 = vmatprep.subr.bf16.mxu1 %v810_v50 }
  0x3e   : > { %489 = vmatpush1.bf16.msra.mxu0 %v812_v51  ;;  %530 = vmatpush1.bf16.msra.mxu1 %v813_v52 }
  0x3f   : > { %744 = vmatprep.subr.msk.bf16.mxu0 %vm465_vm0, %v814_v53  ;;  %746 = vmatprep.subr.msk.bf16.mxu1 %vm465_vm0, %v816_v54 }
  0x42   : > { %491 = vmatpush1.bf16.msra.mxu0 %v467_v57  ;;  %532 = vmatpush1.bf16.msra.mxu1 %v473_v58 }
  0x45   : > { %745 = vmatmul.mubr.msk.bf16.vlgmr.msra.gmra.mrb[0].mxu0 %vm461_vm1, %v296_v59  ;;  %747 = vmatmul.mubr.msk.bf16.vlgmr.msra.gmra.mrb[0].mxu1 %vm461_vm1, %v296_v59 }
 0x118   : > { %v512_v60 = vpop.f32.mrb[0].mxu0  ;;  %v553_v61 = vpop.f32.mrb[0].mxu1 }
 0x119   : > { %560 = vst [vmem:[%s285_s13] sm:$0xff] %v512_v60  ;;  %v571_v62 = vmul.f32 %v512_v60, %v512_v60  ;;  %v514_v63 = vpop.f32.mrb[1].mxu0  ;;  %v555_v0 = vpop.f32.mrb[1].mxu1  ;;  %v573_v1 = vmul.f32 %v553_v61, %v553_v61  ;;  %562 = vst [vmem:[%s285_s13 + $0x10] sm:$0xff] %v553_v61 }
 0x11a   : > { %561 = vst [vmem:[%s285_s13 + $0x8] sm:$0xff] %v514_v63  ;;  %v564_v2 = vadd.f32 %v514_v63, %v512_v60  ;;  %v572_v3 = vmul.f32 %v514_v63, %v514_v63  ;;  %v516_v4 = vpop.f32.mrb[2].mxu0  ;;  %v557_v5 = vpop.f32.mrb[2].mxu1  ;;  %563 = vst [vmem:[%s285_s13 + $0x18] sm:$0xff] %v555_v0  ;;  %v574_v11 = vmul.f32 %v555_v0, %v555_v0 }
 0x11b   : > { %v517_v6 = vpop.f32.mrb[3].mxu0  ;;  %v558_v7 = vpop.f32.mrb[3].mxu1 }
 0x11c   : > { %v565_v8 = vadd.f32 %v564_v2, %v553_v61  ;;  %v575_v9 = vadd.f32 %v572_v3, %v571_v62 }
 0x11e   : > { %v566_v10 = vadd.f32 %v565_v8, %v555_v0  ;;  %v576_v12 = vadd.f32 %v575_v9, %v573_v1 }
 0x120   : > { %567 = vadd.xlane.f32.xlu0 %v566_v10  ;;  %v577_v13 = vadd.f32 %v576_v12, %v574_v11 }
 0x124   : > { %578 = vadd.xlane.f32.xlu0 %v577_v13 }
 0x1ad   : > { %v568_v14 = vpop.xlane.xlu0 %567 }
 0x1ae   : > { %570 = vst.msk [vmem:[%s290_s20] sm:$0xff] %vm569_vm2, %v568_v14 }
 0x1b1   : > { %v579_v15 = vpop.xlane.xlu0 %578 }
 0x1b2   : > { %580 = vst.msk [vmem:[%s294_s24] sm:$0xff] %vm569_vm2, %v579_v15 }
 0x1b3 PF: > { %p12_p10 = scmp.ge.s32.totalorder %s889_s19, 4   ;;  %s1029_s15 = smov %s838_s16 }
 0x1b4   : > { %s1030_s16 = smov %s898_s22  ;;  %s1031_s17 = smov %s889_s19 }
 0x1b5   :  { %14 = sbr.rel (!%p12_p10) target bundleno = 2 (0x2), region = 110 }

</bundles_post_ra>
